<compile_context>
chip_gen: v6e
topology: v6e:2x2x1
jax: 0.10.0
libtpu: 0.0.40
codegen_flags: <defaults>
</compile_context>

<pallas_src>
import jax
import jax.numpy as jnp
from jax import lax
from jax.experimental import pallas as pl
from jax.experimental.pallas import tpu as pltpu


_MIN_TILE_BYTES = 1 << 20   # >=1 MiB streamed tile: ~85% of HBM roofline
_MAX_TILE_BYTES = 4 << 20   # <=4 MiB: 2-3 buffers stay far under scoped VMEM
_MIN_GRID_STEPS = 4         # keep both v7x TensorCores fed on the parallel axis
_LANE = 128


def _round_up(n: int, m: int) -> int:
    return ((n + m - 1) // m) * m


def _choose_tile_rows(n_rows: int, kdim: int, hint_rows=None) -> int:
    """Rows per streamed tile.  Multiple of 128 (lane-dense output blocks,
    8-aligned input sublanes) unless a single block covers the whole array."""
    row_hbm = kdim * 4
    row_vmem = _round_up(kdim, _LANE) * 4
    cap = max(_LANE, (_MAX_TILE_BYTES // row_vmem) // _LANE * _LANE)
    floor = min(cap, _round_up(pl.cdiv(_MIN_TILE_BYTES, row_hbm), _LANE))
    want = _round_up(pl.cdiv(n_rows, _MIN_GRID_STEPS), _LANE)
    if hint_rows is not None:
        want = _round_up(max(int(hint_rows), 1), _LANE)
    tr = max(floor, min(want, cap))
    if n_rows <= tr:
        return n_rows   # one exact block: block dims == full array dims
    return tr


def _streamed_spec(block_shape, index_map, grid_steps: int) -> pl.BlockSpec:
    """Streamed-x BlockSpec; ask for a 3-deep pipeline when the grid is long
    enough to profit (v7x fast HBM), else the default double buffer."""
    if grid_steps >= 3:
        try:
            return pl.BlockSpec(block_shape, index_map,
                                pipeline_mode=pl.Buffered(3))
        except (TypeError, AttributeError):
            pass
    return pl.BlockSpec(block_shape, index_map)


def _linear_kernel(x_ref, w_ref, b_ref, o_ref):
    # x_ref: (tr, kdim)   streamed, lane-packed activations
    # w_ref: (kdim, pack) resident block-diagonal weight
    # b_ref: (1, 1)       bias scalar in SMEM
    # o_ref: (pack, tr)   lane-dense output block (long axis on the 128 lanes)
    acc = lax.dot_general(
        w_ref[...], x_ref[...],
        dimension_numbers=(((0,), (1,)), ((), ())),
        preferred_element_type=jnp.float32,
        precision=lax.Precision.HIGHEST,
    )
    o_ref[...] = (acc + b_ref[0, 0]).astype(o_ref.dtype)


def linear_model_forward(x, weight, bias, *, tile_batch=None):
    """Pallas equivalent of LinearModel.forward (p=0 dropout is identity).

    x:      (B, dim) float32
    weight: (1, dim) float32   (PyTorch nn.Linear layout)
    bias:   (1,)     float32
    returns (B, 1)   float32
    """
    B, dim = x.shape
    dtype = x.dtype

    # Pack `pack` consecutive batch rows into one 128-lane row when dim | 128
    # and B | pack (free contiguous reshape).  Otherwise stay unpacked rather
    # than paying a pad/slice pass over x.
    pack = 128 // dim if (dim <= 128 and 128 % dim == 0) else 1
    if pack > 1 and B % pack != 0:
        pack = 1
    kdim = pack * dim
    rows = B // pack

    hint = None if tile_batch is None else max(1, tile_batch // pack)
    tr = _choose_tile_rows(rows, kdim, hint)
    grid = pl.cdiv(rows, tr)

    x_rows = x.reshape(rows, kdim) if pack > 1 else x

    # Block-diagonal weight: W_bd[s*dim + d, t] = w[d] if s == t else 0.
    w_row = weight.reshape(dim).astype(dtype)
    if pack > 1:
        eye = jnp.eye(pack, dtype=dtype)
        w_bd = (eye[:, None, :] * w_row[None, :, None]).reshape(kdim, pack)
    else:
        w_bd = w_row.reshape(dim, 1)
    b_smem = bias.reshape(1, 1).astype(dtype)

    out = pl.pallas_call(
        _linear_kernel,
        out_shape=jax.ShapeDtypeStruct((pack, rows), dtype),
        grid_spec=pltpu.PrefetchScalarGridSpec(
            num_scalar_prefetch=0,
            grid=(grid,),
            in_specs=[
                _streamed_spec((tr, kdim), lambda i: (i, 0), grid),  # streamed x
                pl.BlockSpec((kdim, pack), lambda i: (0, 0)),        # resident weight
                pl.BlockSpec(memory_space=pltpu.SMEM),               # bias scalar
            ],
            out_specs=pl.BlockSpec((pack, tr), lambda i: (0, i)),
        ),
        compiler_params=pltpu.CompilerParams(
            dimension_semantics=("parallel",)),
    )(x_rows, w_bd, b_smem)

    # (pack, rows) -> (B, 1): tiny reorder over B elements (~1/dim of x traffic).
    if pack > 1:
        out = out.T.reshape(B, 1)
    else:
        out = out.reshape(B, 1)
    return out


if __name__ == "__main__":
    # Module config: LinearModel(dim=32, prior_std=0.5, p=0)
    dim = 32
    prior_std = 0.5

    key = jax.random.PRNGKey(0)
    kx, kw, kb, kx2, kx3 = jax.random.split(key, 5)

    weight = prior_std * jax.random.normal(kw, (1, dim), dtype=jnp.float32)
    bias = prior_std * jax.random.normal(kb, (1,), dtype=jnp.float32)

    def reference(xs):
        # p=0 dropout is identity; exact f32 elementwise reference.
        return jnp.sum(xs * weight.reshape(1, dim), axis=-1, keepdims=True) + bias

    # 1) Small batch consistent with the module: packed path, single exact block.
    x = jax.random.normal(kx, (8, dim), dtype=jnp.float32)
    out = linear_model_forward(x, weight, bias)
    jax.block_until_ready(out)
    assert out.shape == (8, 1)
    assert jnp.allclose(out, reference(x), atol=1e-4, rtol=1e-4)

    # 2) Ragged batch not divisible by the lane pack: zero-copy unpacked fallback.
    x2 = jax.random.normal(kx2, (4113, dim), dtype=jnp.float32)
    out2 = linear_model_forward(x2, weight, bias)
    jax.block_until_ready(out2)
    assert out2.shape == (4113, 1)
    assert jnp.allclose(out2, reference(x2), atol=1e-4, rtol=1e-4)

    # 3) Multi-tile packed path with a masked partial last tile (no padding pass).
    x3 = jax.random.normal(kx3, (16500, dim), dtype=jnp.float32)
    out3 = linear_model_forward(x3, weight, bias)
    jax.block_until_ready(out3)
    assert out3.shape == (16500, 1)
    assert jnp.allclose(out3, reference(x3), atol=1e-4, rtol=1e-4)

    print("KERNEL_OK")
</pallas_src>

<mosaic_0001>
module attributes {stable_mosaic.version = 11 : i64} {
  func.func @_linear_kernel(%arg0: i32, %arg1: memref<2x128xf32, #tpu.memory_space<vmem>>, %arg2: memref<128x4xf32, #tpu.memory_space<vmem>>, %arg3: memref<1x1xf32, #tpu.memory_space<smem>>, %arg4: memref<4x2xf32, #tpu.memory_space<vmem>>) attributes {dimension_semantics = [#tpu.dimension_semantics<parallel>], iteration_bounds = array<i64: 1>, scalar_prefetch = 0 : i64, scratch_operands = 0 : i64, tpu.core_type = #tpu.core_type<tc>, window_params = [{transform_indices = @transform_0, window_bounds = array<i64: 2, 128>}, {pipeline_mode = #tpu.pipeline_mode<synchronous>, transform_indices = @transform_1, window_bounds = array<i64: 128, 4>}, {transform_indices = @transform_2, window_bounds = array<i64: 1, 1>}, {transform_indices = @transform_3, window_bounds = array<i64: 4, 2>}]} {
    %c0 = arith.constant 0 : index
    %c0_0 = arith.constant 0 : index
    %0 = vector.load %arg2[%c0, %c0_0] : memref<128x4xf32, #tpu.memory_space<vmem>>, vector<128x4xf32>
    %c0_1 = arith.constant 0 : index
    %c0_2 = arith.constant 0 : index
    %1 = vector.load %arg1[%c0_1, %c0_2] : memref<2x128xf32, #tpu.memory_space<vmem>>, vector<2x128xf32>
    %cst = arith.constant dense<0.000000e+00> : vector<4x2xf32>
    %2 = tpu.matmul %0, %1, %cst {dimension_numbers = #tpu.dot_dimension_numbers<[0], [1], [1], [0], [0, 1, 1, 0], [], []>, precision = #tpu.contract_precision<fp32>} : vector<128x4xf32>, vector<2x128xf32>, vector<4x2xf32> -> vector<4x2xf32>
    %c0_3 = arith.constant 0 : index
    %c0_4 = arith.constant 0 : index
    %3 = memref.load %arg3[%c0_3, %c0_4] : memref<1x1xf32, #tpu.memory_space<smem>>
    %4 = vector.broadcast %3 : f32 to vector<4x2xf32>
    %5 = arith.addf %2, %4 : vector<4x2xf32>
    %c0_5 = arith.constant 0 : index
    %c0_6 = arith.constant 0 : index
    %6 = vector.load %arg4[%c0_5, %c0_6] : memref<4x2xf32, #tpu.memory_space<vmem>>, vector<4x2xf32>
    tpu.vector_store %arg4[%c0_5, %c0_6], %5 {strides = array<i32>} : memref<4x2xf32, #tpu.memory_space<vmem>>, vector<4x2xf32>,
    return
  }
  func.func @transform_0(%arg0: i32) -> (i32, i32) {
    %c0_i32 = arith.constant 0 : i32
    %c0_i32_0 = arith.constant 0 : i32
    return %arg0, %c0_i32 : i32, i32
  }
  func.func @transform_1(%arg0: i32) -> (i32, i32) {
    %c0_i32 = arith.constant 0 : i32
    %c0_i32_0 = arith.constant 0 : i32
    %c0_i32_1 = arith.constant 0 : i32
    return %c0_i32, %c0_i32_0 : i32, i32
  }
  func.func @transform_2(%arg0: i32) -> (i32, i32) {
    %c0_i32 = arith.constant 0 : i32
    %c0_i32_0 = arith.constant 0 : i32
    %c0_i32_1 = arith.constant 0 : i32
    return %c0_i32, %c0_i32_0 : i32, i32
  }
  func.func @transform_3(%arg0: i32) -> (i32, i32) {
    %c0_i32 = arith.constant 0 : i32
    %c0_i32_0 = arith.constant 0 : i32
    return %c0_i32, %arg0 : i32, i32
  }
}

</mosaic_0001>

<bundles_post_ra>
// kernel: tpu_custom_call.1
= control target key start
LH: loop header
LB: loop body
LE: loop exit
PB: predicated region body
PF: predicated region fallthrough
CT: control target
= control target key end

     0   :  { %v562_v1 = vmov 0.0   ;;  %vm563_vm0 = vmmov 0   ;;  %vm512_vm1 = vcmask 11264   ;;  %s659_s1 = inlined_call_operand.vmem [shape: f32[128,4], index: 1, kind: input, shape index: {}]   ;;  %s660_s0 = inlined_call_operand.vmem [shape: f32[2,128], index: 0, kind: input, shape index: {}]   ;;  %s661_s2 = inlined_call_operand.<no memory space> [shape: f32[1,1], index: 2, kind: input, shape index: {}]   ;;  %s662_s3 = inlined_call_operand.vmem [shape: f32[4,2], index: 3, kind: output, shape index: {}]  }
   0x1   :  { %v15_v0 = vld [vmem:[%s659_s1] sm:$0xff]  ;;  %535 = vmatprep.subr.mxu1 %v562_v1  ;;  %537 = vmatprep.mubr.msk.f32.mxu1 %vm563_vm0, %v562_v1  ;;  %v16_v2 = vld [vmem:[%s659_s1 + $0x8] sm:$0xff]  ;;  %v17_v4 = vld [vmem:[%s659_s1 + $0x10] sm:$0xff]  ;;  %v33_v33 = vstv %s661_s2 }
   0x2   :  { %34 = vxpose.xlu0.b32.start [1/16] (narrow) %v15_v0, 8  ;;  %530 = vmatprep.subr.mxu0 %v562_v1  ;;  %v31_v3 = vld [vmem:[%s660_s0] sm:$0x3]  ;;  %v18_v7 = vld [vmem:[%s659_s1 + $0x18] sm:$0xff]  ;;  %v20_v12 = vld [vmem:[%s659_s1 + $0x28] sm:$0xff] }
   0x3   :  { %532 = vmatprep.mubr.msk.f32.mxu0 %vm563_vm0, %v562_v1  ;;  %v97_v5 = vand.u32 4294901760, %v31_v3  ;;  %v19_v10 = vld [vmem:[%s659_s1 + $0x20] sm:$0xff]  ;;  %v21_v13 = vld [vmem:[%s659_s1 + $0x30] sm:$0xff]  ;;  %v22_v14 = vld [vmem:[%s659_s1 + $0x38] sm:$0xff] }
   0x4   :  { %v23_v15 = vld [vmem:[%s659_s1 + $0x40] sm:$0xff]  ;;  %v24_v16 = vld [vmem:[%s659_s1 + $0x48] sm:$0xff]  ;;  %v25_v17 = vld [vmem:[%s659_s1 + $0x50] sm:$0xff] }
   0x5   :  { %v174_v6 = vsub.f32 %v31_v3, %v97_v5  ;;  %531 = vmatpush3.xpose.msra.mxu0 %v97_v5  ;;  %v26_v18 = vld [vmem:[%s659_s1 + $0x58] sm:$0xff]  ;;  %v27_v19 = vld [vmem:[%s659_s1 + $0x60] sm:$0xff]  ;;  %v28_v20 = vld [vmem:[%s659_s1 + $0x68] sm:$0xff] }
   0x6   :  { %35 = vxpose.xlu0.b32.cont [2/16] (narrow) %v16_v2, 8  ;;  %540 = vmatprep.subr.mxu0 %v562_v1  ;;  %v29_v21 = vld [vmem:[%s659_s1 + $0x70] sm:$0xff]  ;;  %v30_v22 = vld [vmem:[%s659_s1 + $0x78] sm:$0xff] }
   0x7   :  { %v175_v8 = vand.u32 4294901760, %v174_v6 }
   0x9   :  { %v176_v9 = vsub.f32 %v174_v6, %v175_v8 }
   0xa   :  { %36 = vxpose.xlu0.b32.cont [3/16] (narrow) %v17_v4, 8 }
   0xb   :  { %v177_v11 = vand.u32 4294901760, %v176_v9 }
   0xd   :  { %536 = vmatpush3.xpose.msra.mxu1 %v177_v11 }
   0xe   :  { %37 = vxpose.xlu0.b32.cont [4/16] (narrow) %v18_v7, 8  ;;  %545 = vmatprep.subr.mxu1 %v562_v1 }
  0x12   :  { %38 = vxpose.xlu0.b32.cont [5/16] (narrow) %v19_v10, 8 }
  0x16   :  { %39 = vxpose.xlu0.b32.cont [6/16] (narrow) %v20_v12, 8 }
  0x1a   :  { %40 = vxpose.xlu0.b32.cont [7/16] (narrow) %v21_v13, 8 }
  0x1e   :  { %41 = vxpose.xlu0.b32.cont [8/16] (narrow) %v22_v14, 8 }
  0x22   :  { %42 = vxpose.xlu0.b32.cont [9/16] (narrow) %v23_v15, 8 }
  0x26   :  { %43 = vxpose.xlu0.b32.cont [10/16] (narrow) %v24_v16, 8 }
  0x2a   :  { %44 = vxpose.xlu0.b32.cont [11/16] (narrow) %v25_v17, 8 }
  0x2e   :  { %45 = vxpose.xlu0.b32.cont [12/16] (narrow) %v26_v18, 8 }
  0x32   :  { %46 = vxpose.xlu0.b32.cont [13/16] (narrow) %v27_v19, 8 }
  0x36   :  { %47 = vxpose.xlu0.b32.cont [14/16] (narrow) %v28_v20, 8 }
  0x3a   :  { %48 = vxpose.xlu0.b32.cont [15/16] (narrow) %v29_v21, 8 }
  0x3e   :  { %49 = vxpose.xlu0.b32.end [16/16] (narrow) %v30_v22, 8 }
  0x7e   :  { %v50_v23 = vpop.trf.xlu0 }
  0x7f   :  { %v132_v24 = vand.u32 4294901760, %v50_v23 }
  0x81   :  { %v133_v25 = vsub.f32 %v50_v23, %v132_v24  ;;  %538 = vmatmul.mubr.f32.vlgmr.msra.gmra.mxu1 %v132_v24 }
  0x82   :  { %546 = vmatpush3.xpose.msra.mxu1 %v97_v5  ;;  %547 = vmatprep.mubr.msk.f32.mxu1 %vm563_vm0, %v562_v1 }
  0x83   :  { %v134_v26 = vand.u32 4294901760, %v133_v25  ;;  %555 = vmatprep.subr.mxu1 %v562_v1 }
  0x85   :  { %548 = vmatmul.mubr.f32.vlgmr.msra.gmra.mxu1 %v134_v26  ;;  %v135_v27 = vsub.f32 %v133_v25, %v134_v26 }
  0x86   :  { %556 = vmatpush3.xpose.msra.mxu1 %v97_v5  ;;  %557 = vmatprep.mubr.msk.f32.mxu1 %vm563_vm0, %v562_v1 }
  0x87   :  { %v136_v28 = vand.u32 4294901760, %v135_v27 }
  0x89   :  { %533 = vmatmul.mubr.f32.vlgmr.msra.gmra.mxu0 %v136_v28  ;;  %558 = vmatmul.mubr.f32.vlgmr.msra.gmra.mxu1 %v132_v24 }
  0x8a   :  { %541 = vmatpush3.xpose.msra.mxu0 %v174_v6  ;;  %542 = vmatprep.mubr.msk.f32.mxu0 %vm563_vm0, %v562_v1 }
  0x8b   :  { %550 = vmatprep.subr.mxu0 %v562_v1 }
  0x8d   :  { %543 = vmatmul.mubr.f32.vlgmr.msra.gmra.mxu0 %v133_v25 }
  0x8e   :  { %551 = vmatpush3.xpose.msra.mxu0 %v175_v8  ;;  %552 = vmatprep.mubr.msk.f32.mxu0 %vm563_vm0, %v562_v1 }
  0x91   :  { %553 = vmatmul.mubr.f32.vlgmr.msra.gmra.mxu0 %v132_v24 }
 0x141   :  { %v214_v29 = vpop.f32.mrf.mxu1 }
 0x143   :  { %v539_v30 = vpop.f32.mrf.mxu1 }
 0x145   :  { %v362_v31 = vpop.f32.mrf.mxu1 }
 0x147   :  { %v549_v32 = vpop.f32.mrf.mxu1 }
 0x149   :  { %v138_v34 = vpop.f32.mrf.mxu0  ;;  %v508_v35 = vpop.f32.mrf.mxu1 }
 0x14a   :  { %v139_v36 = vadd.f32 %v138_v34, %v33_v33 }
 0x14b   :  { %v534_v37 = vpop.f32.mrf.mxu0  ;;  %v559_v38 = vpop.f32.mrf.mxu1 }
 0x14c   :  { %v215_v39 = vadd.f32 %v214_v29, %v139_v36 }
 0x14d   :  { %v288_v40 = vpop.f32.mrf.mxu0 }
 0x14e   :  { %v289_v41 = vadd.f32 %v288_v40, %v215_v39 }
 0x14f   :  { %v544_v42 = vpop.f32.mrf.mxu0 }
 0x150   :  { %v363_v43 = vadd.f32 %v362_v31, %v289_v41 }
 0x151   :  { %v436_v44 = vpop.f32.mrf.mxu0 }
 0x152   :  { %v437_v45 = vadd.f32 %v436_v44, %v363_v43 }
 0x153   :  { %v554_v46 = vpop.f32.mrf.mxu0 }
 0x154   :  { %v509_v47 = vadd.f32 %v508_v35, %v437_v45 }
 0x156   :  { %513 = vst.msk [vmem:[%s662_s3] sm:$0xf] %vm512_vm1, %v509_v47 }

</bundles_post_ra>
